<compile_context>
chip_gen: v6e
topology: v6e:2x2x1
jax: 0.10.0
libtpu: 0.0.40
codegen_flags: <defaults>
</compile_context>

<pallas_src>
import jax
import jax.numpy as jnp
import numpy as np
from jax import lax
from jax.experimental import pallas as pl
from jax.experimental.pallas import tpu as pltpu


# ---------------------------------------------------------------------------
# Pallas kernels (transposed, lane-dense tiles)
# ---------------------------------------------------------------------------
def _conv_relu_t_kernel(p_ref, w_ref, b_ref, o_ref):
    # conv1 as transposed im2col matmul + bias + ReLU.
    # p_ref: (KP, block_m) bf16, w_ref: (OCP, KP) bf16, b_ref: (OCP, 1) f32
    acc = jnp.dot(w_ref[...], p_ref[...], preferred_element_type=jnp.float32)
    o_ref[...] = jnp.maximum(acc + b_ref[...], 0.0)


def _conv_relu_add_t_kernel(p_ref, w_ref, b_ref, r_ref, o_ref):
    # conv2 as transposed im2col matmul + bias + ReLU, fused residual add.
    # r_ref: (OCP, block_m) f32 — already max-pooled residual (no 9x tap duplication).
    acc = jnp.dot(w_ref[...], p_ref[...], preferred_element_type=jnp.float32)
    y = jnp.maximum(acc + b_ref[...], 0.0)
    o_ref[...] = y + r_ref[...]


_COMPILER_PARAMS = pltpu.CompilerParams(
    dimension_semantics=("parallel",),          # shard blocks across v7x's 2 TCs
    vmem_limit_bytes=32 * 1024 * 1024,          # explicit budget; tiles are tiny here
)


def conv_relu_t(p_t, w_t, b_col, *, block_m):
    KP, M = p_t.shape
    OCP = w_t.shape[0]
    return pl.pallas_call(
        _conv_relu_t_kernel,
        out_shape=jax.ShapeDtypeStruct((OCP, M), jnp.float32),
        grid_spec=pltpu.PrefetchScalarGridSpec(
            num_scalar_prefetch=0,
            grid=(M // block_m,),
            in_specs=[
                pl.BlockSpec((KP, block_m), lambda i: (0, i)),
                pl.BlockSpec((OCP, KP), lambda i: (0, 0)),
                pl.BlockSpec((OCP, 1), lambda i: (0, 0)),
            ],
            out_specs=pl.BlockSpec((OCP, block_m), lambda i: (0, i)),
        ),
        compiler_params=_COMPILER_PARAMS,
    )(p_t, w_t, b_col)


def conv_relu_add_t(p_t, w_t, b_col, pooled_t, *, block_m):
    KP, M = p_t.shape
    OCP = w_t.shape[0]
    assert pooled_t.shape == (OCP, M)
    return pl.pallas_call(
        _conv_relu_add_t_kernel,
        out_shape=jax.ShapeDtypeStruct((OCP, M), jnp.float32),
        grid_spec=pltpu.PrefetchScalarGridSpec(
            num_scalar_prefetch=0,
            grid=(M // block_m,),
            in_specs=[
                pl.BlockSpec((KP, block_m), lambda i: (0, i)),
                pl.BlockSpec((OCP, KP), lambda i: (0, 0)),
                pl.BlockSpec((OCP, 1), lambda i: (0, 0)),
                pl.BlockSpec((OCP, block_m), lambda i: (0, i)),
            ],
            out_specs=pl.BlockSpec((OCP, block_m), lambda i: (0, i)),
        ),
        compiler_params=_COMPILER_PARAMS,
    )(p_t, w_t, b_col, pooled_t)


# ---------------------------------------------------------------------------
# Plain-JAX glue: replication padding, transposed im2col, weight/bias packing
# ---------------------------------------------------------------------------
def _round_up(x, m):
    return ((x + m - 1) // m) * m


def _rep_pad_nhwc(x, left, right, top, bottom):
    return jnp.pad(x, ((0, 0), (top, bottom), (left, right), (0, 0)), mode="edge")


def _im2col_t(x_nhwc, kh, kw, sh, sw, k_pad):
    """Transposed im2col: returns (k_pad, N*OH*OW), rows ordered (i, j, c), zero-padded."""
    N, H, W, C = x_nhwc.shape
    OH = (H - kh) // sh + 1
    OW = (W - kw) // sw + 1
    taps = []
    for i in range(kh):
        for j in range(kw):
            taps.append(
                x_nhwc[:, i : i + (OH - 1) * sh + 1 : sh,
                          j : j + (OW - 1) * sw + 1 : sw, :]
            )
    pat = jnp.stack(taps, axis=3)                       # (N, OH, OW, kh*kw, C)
    pat_t = pat.reshape(N * OH * OW, kh * kw * C).T     # (K, M)
    K = kh * kw * C
    if k_pad > K:
        pat_t = jnp.pad(pat_t, ((0, k_pad - K), (0, 0)))
    return pat_t, (N, OH, OW)


def _weight_t(w_oihw, ocp, k_pad):
    """(OC, IC, kh, kw) -> (OCP, KP) bf16 with K ordered (i, j, c), zero-padded."""
    OC, IC, kh, kw = w_oihw.shape
    wt = jnp.transpose(w_oihw, (0, 2, 3, 1)).reshape(OC, kh * kw * IC)
    wt = jnp.pad(wt, ((0, ocp - OC), (0, k_pad - kh * kw * IC)))
    return wt.astype(jnp.bfloat16)


def _bias_col(b, ocp):
    return jnp.pad(b.astype(jnp.float32), (0, ocp - b.shape[0])).reshape(ocp, 1)


def residual_layer_v1_forward(x_nchw, params, *, kernel_size, stride, padding,
                              block_m=None):
    kh, kw = kernel_size
    sh, sw = stride
    p_l, p_r, p_t, p_b = padding  # ReplicationPad2d order: (left, right, top, bottom)
    w1, b1, w2, b2 = params["w1"], params["b1"], params["w2"], params["b2"]
    OC, IC = w1.shape[0], w1.shape[1]
    assert IC == OC, "script covers the dif_channels == 0 residual path"
    OCP = _round_up(OC, 8)

    x = jnp.transpose(x_nchw, (0, 2, 3, 1)).astype(jnp.float32)   # NCHW -> NHWC
    N, H, W, C = x.shape

    # conv1: same_padding -> conv(stride) -> ReLU
    xp = _rep_pad_nhwc(x, p_l, p_r, p_t, p_b)
    K1P = _round_up(kh * kw * C, 8)
    p1t, (N_, OH, OW) = _im2col_t(xp, kh, kw, sh, sw, K1P)
    p1t = p1t.astype(jnp.bfloat16)
    M = N_ * OH * OW

    if block_m is None:
        block_m = min(512, M)
    assert M % 128 == 0, "flattened output pixels must be a multiple of 128 (lane-dense layout)"
    assert block_m % 128 == 0 and M % block_m == 0

    w1t = _weight_t(w1, OCP, K1P)
    b1c = _bias_col(b1, OCP)
    y1t = conv_relu_t(p1t, w1t, b1c, block_m=block_m)             # (OCP, M) f32

    # conv2: same_padding2 -> conv(stride 1) -> ReLU (residual add fused in kernel)
    y1 = jnp.transpose(y1t[:OC].reshape(OC, N_, OH, OW), (1, 2, 3, 0))   # NHWC
    l2 = kw // 2 - 1 + kw % 2
    r2 = kw // 2
    t2 = kh // 2 - 1 + kh % 2
    d2 = kh // 2
    y1p = _rep_pad_nhwc(y1, l2, r2, t2, d2)
    K2P = _round_up(kh * kw * OC, 8)
    p2t, (N2, OH2, OW2) = _im2col_t(y1p, kh, kw, 1, 1, K2P)
    p2t = p2t.astype(jnp.bfloat16)
    w2t = _weight_t(w2, OCP, K2P)
    b2c = _bias_col(b2, OCP)

    # residual branch: ReplicationPad2d(padding) + MaxPool2d(kernel_size, stride),
    # computed once here (single (OCP, M) tensor instead of kh*kw duplicated taps).
    pooled = lax.reduce_window(xp, -jnp.inf, lax.max,
                               (1, kh, kw, 1), (1, sh, sw, 1), "VALID")   # (N, OH, OW, C)
    pooled_t = jnp.pad(pooled.reshape(M, C).T, ((0, OCP - C), (0, 0))).astype(jnp.float32)

    outt = conv_relu_add_t(p2t, w2t, b2c, pooled_t, block_m=block_m)      # (OCP, M) f32
    out = jnp.transpose(outt[:OC].reshape(OC, N2, OH2, OW2), (1, 0, 2, 3))
    return out                                                            # NCHW


# ---------------------------------------------------------------------------
# Pure-JAX reference (mirrors the PyTorch forward, f32) for a sanity check
# ---------------------------------------------------------------------------
def reference_forward(x_nchw, params, *, kernel_size, stride, padding):
    kh, kw = kernel_size
    sh, sw = stride
    p_l, p_r, p_t, p_b = padding
    w1, b1, w2, b2 = params["w1"], params["b1"], params["w2"], params["b2"]

    def rep_pad(x, l, r, t, b):
        return jnp.pad(x, ((0, 0), (0, 0), (t, b), (l, r)), mode="edge")

    residual = x_nchw
    x = rep_pad(x_nchw, p_l, p_r, p_t, p_b)
    x = lax.conv_general_dilated(x, w1, window_strides=(sh, sw), padding="VALID",
                                 dimension_numbers=("NCHW", "OIHW", "NCHW"))
    x = jnp.maximum(x + b1.reshape(1, -1, 1, 1), 0.0)

    l2 = kw // 2 - 1 + kw % 2
    r2 = kw // 2
    t2 = kh // 2 - 1 + kh % 2
    d2 = kh // 2
    x = rep_pad(x, l2, r2, t2, d2)
    x = lax.conv_general_dilated(x, w2, window_strides=(1, 1), padding="VALID",
                                 dimension_numbers=("NCHW", "OIHW", "NCHW"))
    x = jnp.maximum(x + b2.reshape(1, -1, 1, 1), 0.0)

    resp = rep_pad(residual, p_l, p_r, p_t, p_b)
    pooled = lax.reduce_window(resp, -jnp.inf, lax.max,
                               (1, 1, kh, kw), (1, 1, sh, sw), "VALID")
    return x + pooled


# ---------------------------------------------------------------------------
if __name__ == "__main__":
    # ResidualLayerV1(in_channels=4, out_channels=4, kernel_size=(3,3),
    #                 stride=(2,2), padding=(1,1,1,1))
    N, C, H, W = 2, 4, 16, 16
    kernel_size = (3, 3)
    stride = (2, 2)
    padding = (1, 1, 1, 1)

    key = jax.random.PRNGKey(0)
    kx, k1, k2, k3, k4 = jax.random.split(key, 5)
    x = jax.random.normal(kx, (N, C, H, W), dtype=jnp.float32)
    params = {
        "w1": 0.2 * jax.random.normal(k1, (C, C) + kernel_size, dtype=jnp.float32),
        "b1": 0.1 * jax.random.normal(k2, (C,), dtype=jnp.float32),
        "w2": 0.2 * jax.random.normal(k3, (C, C) + kernel_size, dtype=jnp.float32),
        "b2": 0.1 * jax.random.normal(k4, (C,), dtype=jnp.float32),
    }

    out = residual_layer_v1_forward(x, params, kernel_size=kernel_size,
                                    stride=stride, padding=padding)
    out = jax.block_until_ready(out)

    ref = jax.block_until_ready(
        reference_forward(x, params, kernel_size=kernel_size,
                          stride=stride, padding=padding))

    assert out.shape == (N, C, 8, 8), out.shape
    # bf16 matmul inputs with f32 accumulation vs an all-f32 reference -> loosen slightly.
    assert np.allclose(np.asarray(out), np.asarray(ref), rtol=1e-2, atol=2e-2), (
        "mismatch vs reference")
    print("KERNEL_OK")
</pallas_src>

<mosaic_0001>
module attributes {stable_mosaic.version = 11 : i64} {
  func.func @_conv_relu_t_kernel(%arg0: i32, %arg1: memref<40x128xbf16, #tpu.memory_space<vmem>>, %arg2: memref<8x40xbf16, #tpu.memory_space<vmem>>, %arg3: memref<8x1xf32, #tpu.memory_space<vmem>>, %arg4: memref<8x128xf32, #tpu.memory_space<vmem>>) attributes {dimension_semantics = [#tpu.dimension_semantics<parallel>], iteration_bounds = array<i64: 1>, scalar_prefetch = 0 : i64, scratch_operands = 0 : i64, tpu.core_type = #tpu.core_type<tc>, window_params = [{transform_indices = @transform_0, window_bounds = array<i64: 40, 128>}, {pipeline_mode = #tpu.pipeline_mode<synchronous>, transform_indices = @transform_1, window_bounds = array<i64: 8, 40>}, {pipeline_mode = #tpu.pipeline_mode<synchronous>, transform_indices = @transform_2, window_bounds = array<i64: 8, 1>}, {transform_indices = @transform_3, window_bounds = array<i64: 8, 128>}]} {
    %c0 = arith.constant 0 : index
    %c0_0 = arith.constant 0 : index
    %0 = vector.load %arg2[%c0, %c0_0] : memref<8x40xbf16, #tpu.memory_space<vmem>>, vector<8x40xbf16>
    %c0_1 = arith.constant 0 : index
    %c0_2 = arith.constant 0 : index
    %1 = vector.load %arg1[%c0_1, %c0_2] : memref<40x128xbf16, #tpu.memory_space<vmem>>, vector<40x128xbf16>
    %cst = arith.constant dense<0.000000e+00> : vector<8x128xf32>
    %2 = tpu.matmul %0, %1, %cst {dimension_numbers = #tpu.dot_dimension_numbers<[1], [0], [0], [1], [0, 0, 1, 1], [], []>} : vector<8x40xbf16>, vector<40x128xbf16>, vector<8x128xf32> -> vector<8x128xf32>
    %c0_3 = arith.constant 0 : index
    %c0_4 = arith.constant 0 : index
    %3 = vector.load %arg3[%c0_3, %c0_4] : memref<8x1xf32, #tpu.memory_space<vmem>>, vector<8x1xf32>
    %4 = vector.broadcast %3 : vector<8x1xf32> to vector<8x128xf32>
    %5 = arith.addf %2, %4 : vector<8x128xf32>
    %cst_5 = arith.constant 0.000000e+00 : f32
    %6 = vector.broadcast %cst_5 : f32 to vector<8x128xf32>
    %7 = arith.maximumf %5, %6 : vector<8x128xf32>
    %c0_6 = arith.constant 0 : index
    %c0_7 = arith.constant 0 : index
    %8 = vector.load %arg4[%c0_6, %c0_7] : memref<8x128xf32, #tpu.memory_space<vmem>>, vector<8x128xf32>
    tpu.vector_store %arg4[%c0_6, %c0_7], %7 {strides = array<i32>} : memref<8x128xf32, #tpu.memory_space<vmem>>, vector<8x128xf32>,
    return
  }
  func.func @transform_0(%arg0: i32) -> (i32, i32) {
    %c0_i32 = arith.constant 0 : i32
    %c0_i32_0 = arith.constant 0 : i32
    return %c0_i32, %arg0 : i32, i32
  }
  func.func @transform_1(%arg0: i32) -> (i32, i32) {
    %c0_i32 = arith.constant 0 : i32
    %c0_i32_0 = arith.constant 0 : i32
    %c0_i32_1 = arith.constant 0 : i32
    return %c0_i32, %c0_i32_0 : i32, i32
  }
  func.func @transform_2(%arg0: i32) -> (i32, i32) {
    %c0_i32 = arith.constant 0 : i32
    %c0_i32_0 = arith.constant 0 : i32
    %c0_i32_1 = arith.constant 0 : i32
    return %c0_i32, %c0_i32_0 : i32, i32
  }
  func.func @transform_3(%arg0: i32) -> (i32, i32) {
    %c0_i32 = arith.constant 0 : i32
    %c0_i32_0 = arith.constant 0 : i32
    return %c0_i32, %arg0 : i32, i32
  }
}

</mosaic_0001>

<bundles_post_ra>
// kernel: tpu_custom_call.1
= control target key start
LH: loop header
LB: loop body
LE: loop exit
PB: predicated region body
PF: predicated region fallthrough
CT: control target
= control target key end

     0   :  { %8 = vsyncpa [#allocation3], 0  ;;  %s234_s0 = inlined_call_operand.hbm [shape: bf16[40,128], index: 0, kind: input, shape index: {}]   ;;  %s235_s1 = inlined_call_operand.vmem [shape: bf16[8,40], index: 1, kind: input, shape index: {}]   ;;  %s236_s2 = inlined_call_operand.vmem [shape: f32[8,1], index: 2, kind: input, shape index: {}]   ;;  %s237_s3 = inlined_call_operand.hbm [shape: f32[8,128], index: 3, kind: output, shape index: {}]  }
   0x1   :  { %9 = vsyncpa [#allocation4], 0  ;;  %s195_s12 = smov [#allocation2]  }
   0x2   :  { %s15_s13 = sshll.u32 %s195_s12, 4  ;;  %s16_s13 = int_to_ptr.vmem [resolvable:$true] %s15_s13 }
   0x3   :  { %s159_s14 = scalar_lea.vmem %s16_s13, 320  ;;  %p164_p1 = scmp.lt.s32.totalorder %s16_s13, %s16_s13 }
   0x4   :  { %p160_p0 = scmp.ne.s32.totalorder %s16_s13, %s159_s14  ;;  %p165_p2 = scmp.lt.s32.totalorder %s159_s14, %s159_s14 }
   0x6   :  { %p166_p3 = por %p165_p2, %p164_p1 }
   0x8   :  { %p167_p4 = pnand %p166_p3, %p160_p0 }
   0xa   :  { %170 = shalt.err (!%p167_p4)
}
   0xb   :  { %s196_s15 = smov 64   ;;  %s197_s16 = smov 4  }
   0xc   :  { %21 = dma.hbm_to_vmem [thread:$0]  %s234_s0, 320, %s16_s13, [#allocation3], %s196_s15, %s196_s15, %s197_s16  }
   0xd   :  { %191 = dma.done.wait [#allocation3], 320  }
   0xe   :  { %192 = vsyncadd [#allocation3], 4294966976  ;;  %v198_v0 = vmov 0.0   ;;  %vm199_vm0 = vmmov 0   ;;  %v200_v1 = vmov 0   ;;  %vm61_vm1 = vcmask 1043456  }
   0xf   :  { %130 = vmatprep.subr.bf16.mxu0 %v198_v0  ;;  %136 = vmatprep.mubr.msk.bf16.mxu0 %vm199_vm0, %v198_v0  ;;  %v148_v2 = vld [vmem:[#allocation2 + $0x10] ss:$0 sps:$4 sm:$0xff]   ;;  %v149_v4 = vld [vmem:[#allocation2 + $0x8] sm:$0xff]   ;;  %v36_v5 = vld [vmem:[%s236_s2] sm:$0xff]  ;;  %vm57_vm2 = vcmask 326656   ;;  %s201_s22 = smov [#allocation5]  }
  0x10   :  { %147 = vset.pattern.permute.xlu0 %v200_v1  ;;  %v63_v3 = vsel %vm61_vm1, %v148_v2, 0  ;;  %v150_v6 = vld [vmem:[#allocation2] sm:$0xff]   ;;  %s113_s23 = sshll.u32 %s201_s22, 4  ;;  %s114_s23 = int_to_ptr.vmem [resolvable:$true] %s113_s23 }
  0x11   :  { %131 = vmatpush3.bf16.msra.mxu0 %v63_v3  ;;  %39 = vperm.xlu0 %147, %v36_v5   ;;  %v30_v7 = vld [vmem:[%s235_s1] sm:$0xf]  ;;  %s171_s2 = scalar_lea.vmem %s114_s23, 128  ;;  %p176_p6 = scmp.lt.s32.totalorder %s114_s23, %s114_s23 }
  0x12   :  { %132 = vmatprep.subr.bf16.mxu0 %v198_v0  ;;  %p172_p5 = scmp.ne.s32.totalorder %s114_s23, %s171_s2  ;;  %p177_p7 = scmp.lt.s32.totalorder %s171_s2, %s171_s2 }
  0x14   :  { %p178_p8 = por %p177_p7, %p176_p6 }
  0x15   :  { %133 = vmatpush3.bf16.msra.mxu0 %v149_v4 }
  0x16   :  { %134 = vmatprep.subr.bf16.mxu0 %v198_v0  ;;  %p179_p9 = pnand %p178_p8, %p172_p5 }
  0x19   :  { %135 = vmatpush3.bf16.msra.mxu0 %v150_v6 }
  0x1c   :  { %137 = vmatmul.mubr.msk.bf16.vlgmr.msra.gmra.mxu0 %vm57_vm2, %v30_v7 }
  0x8c   :  { %v40_v8 = vpop.permute.xlu0 %39 }
  0xdc   :  { %v99_v9 = vpop.f32.mrf.mxu0 }
  0xdd   :  { %v100_v10 = vadd.f32 %v99_v9, %v40_v8 }
  0xde   :  { %v138_v11 = vpop.f32.mrf.mxu0 }
  0xdf   :  { %v105_v12 = vmax.f32 %v100_v10, 0.0 }
  0xe0   :  { %v102_v13 = vpop.f32.mrf.mxu0 }
  0xe1   :  { %106 = vst [vmem:[#allocation5] sm:$0xff] %v105_v12 }
  0xe2   :  { %v139_v14 = vpop.f32.mrf.mxu0 }
  0xe3   :  { %182 = shalt.err (!%p179_p9)
}
  0xe4   :  { %116 = dma.vmem_to_hbm [thread:$0]  %s114_s23, 128, %s237_s3, [#allocation4]  }
  0xe5   :  { %193 = dma.done.wait [#allocation4], 128  }
  0xe6   :  { %194 = vsyncadd [#allocation4], 4294967168 }
  0xe7   :  { %120 = vsyncpa [#allocation3], 1 }
  0xe8   :  { %121 = vsyncpa [#allocation4], 1 }

</bundles_post_ra>
